<compile_context>
chip_gen: v6e
topology: v6e:2x2x1
jax: 0.10.0
libtpu: 0.0.40
codegen_flags: <defaults>
</compile_context>

<pallas_src>
import jax
import jax.numpy as jnp
from jax.experimental import pallas as pl
from jax.experimental.pallas import tpu as pltpu

HIDDEN_SIZE = 768   # bert-base-uncased hidden_size
NUM_CLASSES = 2
DROPOUT_P = 0.1     # hidden_dropout_prob (identity at inference)

LANE = 128
SUBLANE = 8
TB_MAX = 2048       # batch-tile rows; ~12 MiB double-buffered x at f32


def _round_up(x, m):
    return ((x + m - 1) // m) * m


def _classifier_kernel(x_ref, w_ref, b_ref, o_ref):
    # x_ref: [TB, H]          w_ref: [H, 128] (cols >= NUM_CLASSES are zero)
    # b_ref: [1, NUM_CLASSES] o_ref: [TB, NUM_CLASSES]
    n = o_ref.shape[-1]
    acc = jnp.dot(x_ref[...], w_ref[...], preferred_element_type=jnp.float32)
    o_ref[...] = (acc[:, :n] + b_ref[...]).astype(o_ref.dtype)


def prepare_classifier_params(weight, bias):
    """One-time parameter prep (hoisted out of the forward path).

    weight: [NUM_CLASSES, H] (PyTorch nn.Linear layout), bias: [NUM_CLASSES].
    Returns (w_t [H, 128] transposed + zero lane-padded, b2d [1, NUM_CLASSES]).
    """
    n_classes, H = weight.shape
    w_t = jnp.zeros((H, LANE), dtype=weight.dtype).at[:, :n_classes].set(weight.T)
    b2d = bias.reshape(1, n_classes)
    return w_t, b2d


def linear_classifier(x, w_t, b2d, *, block_b=TB_MAX):
    """x: [B, H] (f32 or bf16). w_t/b2d from prepare_classifier_params."""
    B, H = x.shape
    n_classes = b2d.shape[-1]

    # Dropout is a no-op at inference.
    # TODO(synk): training-mode dropout (mask + 1/(1-p) scaling) could be added
    # with pltpu.prng_seed / pltpu.prng_random_bits if needed.

    # Batch tile: multiple of 8 sublanes, capped at block_b. Prefer >= 2 grid
    # steps (and an even tile count) so both v7x TensorCores get balanced work.
    tb = max(SUBLANE, min(block_b, _round_up(pl.cdiv(B, 2), SUBLANE)))
    n_tiles = pl.cdiv(B, tb)
    if n_tiles > 1:
        n_tiles = _round_up(n_tiles, 2)
        tb = max(SUBLANE, _round_up(pl.cdiv(B, n_tiles), SUBLANE))
    grid = (pl.cdiv(B, tb),)   # ragged final block handled by Pallas (no jnp.pad)

    return pl.pallas_call(
        _classifier_kernel,
        out_shape=jax.ShapeDtypeStruct((B, n_classes), x.dtype),
        grid=grid,
        in_specs=[
            pl.BlockSpec((tb, H), lambda i: (i, 0)),           # stream x tiles (double-buffered DMA)
            pl.BlockSpec((H, LANE), lambda i: (0, 0)),         # weight stays VMEM-resident
            pl.BlockSpec((1, n_classes), lambda i: (0, 0)),    # bias stays VMEM-resident
        ],
        out_specs=pl.BlockSpec((tb, n_classes), lambda i: (i, 0)),  # narrow, full-last-dim output
        compiler_params=pltpu.CompilerParams(
            dimension_semantics=("parallel",),   # independent batch tiles; megacore on v7x
            vmem_limit_bytes=32 << 20,           # lets the 2048-row tile fit on v5e too
        ),
    )(x, w_t, b2d)


if __name__ == "__main__":
    key = jax.random.PRNGKey(0)
    kx, kw, kb = jax.random.split(key, 3)

    B = 12  # deliberately not a multiple of the tile to exercise the ragged last block
    x = jax.random.normal(kx, (B, HIDDEN_SIZE), dtype=jnp.float32)

    # Deterministic parameter init (mimics nn.Linear's uniform(-1/sqrt(H), 1/sqrt(H)))
    bound = 1.0 / jnp.sqrt(jnp.float32(HIDDEN_SIZE))
    weight = jax.random.uniform(kw, (NUM_CLASSES, HIDDEN_SIZE),
                                minval=-bound, maxval=bound, dtype=jnp.float32)
    bias = jax.random.uniform(kb, (NUM_CLASSES,),
                              minval=-bound, maxval=bound, dtype=jnp.float32)

    # One-time prep (cached across forward calls in real use).
    w_t, b2d = prepare_classifier_params(weight, bias)

    out = linear_classifier(x, w_t, b2d)
    out = jax.block_until_ready(out)

    # Sanity check against plain JAX reference
    ref = x @ weight.T + bias
    assert out.shape == (B, NUM_CLASSES)
    assert jnp.allclose(out, ref, atol=1e-4, rtol=1e-4)

    print("KERNEL_OK")
</pallas_src>

<mosaic_0001>
module attributes {stable_mosaic.version = 11 : i64} {
  func.func @_classifier_kernel(%arg0: i32, %arg1: memref<8x768xf32, #tpu.memory_space<vmem>>, %arg2: memref<768x128xf32, #tpu.memory_space<vmem>>, %arg3: memref<1x2xf32, #tpu.memory_space<vmem>>, %arg4: memref<8x2xf32, #tpu.memory_space<vmem>>) attributes {dimension_semantics = [#tpu.dimension_semantics<parallel>], iteration_bounds = array<i64: 2>, scalar_prefetch = 0 : i64, scratch_operands = 0 : i64, tpu.core_type = #tpu.core_type<tc>, window_params = [{transform_indices = @transform_0, window_bounds = array<i64: 8, 768>}, {pipeline_mode = #tpu.pipeline_mode<synchronous>, transform_indices = @transform_1, window_bounds = array<i64: 768, 128>}, {pipeline_mode = #tpu.pipeline_mode<synchronous>, transform_indices = @transform_2, window_bounds = array<i64: 1, 2>}, {transform_indices = @transform_3, window_bounds = array<i64: 8, 2>}]} {
    %c0 = arith.constant 0 : index
    %c0_0 = arith.constant 0 : index
    %0 = vector.load %arg1[%c0, %c0_0] : memref<8x768xf32, #tpu.memory_space<vmem>>, vector<8x768xf32>
    %c0_1 = arith.constant 0 : index
    %c0_2 = arith.constant 0 : index
    %1 = vector.load %arg2[%c0_1, %c0_2] : memref<768x128xf32, #tpu.memory_space<vmem>>, vector<768x128xf32>
    %cst = arith.constant dense<0.000000e+00> : vector<8x128xf32>
    %2 = tpu.matmul %0, %1, %cst {dimension_numbers = #tpu.dot_dimension_numbers<[1], [0], [0], [1], [0, 0, 1, 1], [], []>} : vector<8x768xf32>, vector<768x128xf32>, vector<8x128xf32> -> vector<8x128xf32>
    %3 = vector.extract_strided_slice %2 {offsets = [0, 0], sizes = [8, 2], strides = [1, 1]} : vector<8x128xf32> to vector<8x2xf32>
    %c0_3 = arith.constant 0 : index
    %c0_4 = arith.constant 0 : index
    %4 = vector.load %arg3[%c0_3, %c0_4] : memref<1x2xf32, #tpu.memory_space<vmem>>, vector<1x2xf32>
    %5 = vector.broadcast %4 : vector<1x2xf32> to vector<8x2xf32>
    %6 = arith.addf %3, %5 : vector<8x2xf32>
    %c0_5 = arith.constant 0 : index
    %c0_6 = arith.constant 0 : index
    %7 = vector.load %arg4[%c0_5, %c0_6] : memref<8x2xf32, #tpu.memory_space<vmem>>, vector<8x2xf32>
    tpu.vector_store %arg4[%c0_5, %c0_6], %6 {strides = array<i32>} : memref<8x2xf32, #tpu.memory_space<vmem>>, vector<8x2xf32>,
    return
  }
  func.func @transform_0(%arg0: i32) -> (i32, i32) {
    %c0_i32 = arith.constant 0 : i32
    %c0_i32_0 = arith.constant 0 : i32
    return %arg0, %c0_i32 : i32, i32
  }
  func.func @transform_1(%arg0: i32) -> (i32, i32) {
    %c0_i32 = arith.constant 0 : i32
    %c0_i32_0 = arith.constant 0 : i32
    %c0_i32_1 = arith.constant 0 : i32
    return %c0_i32, %c0_i32_0 : i32, i32
  }
  func.func @transform_2(%arg0: i32) -> (i32, i32) {
    %c0_i32 = arith.constant 0 : i32
    %c0_i32_0 = arith.constant 0 : i32
    %c0_i32_1 = arith.constant 0 : i32
    return %c0_i32, %c0_i32_0 : i32, i32
  }
  func.func @transform_3(%arg0: i32) -> (i32, i32) {
    %c0_i32 = arith.constant 0 : i32
    %c0_i32_0 = arith.constant 0 : i32
    return %arg0, %c0_i32 : i32, i32
  }
}

</mosaic_0001>

<bundles_post_ra>
// kernel: tpu_custom_call.1
= control target key start
LH: loop header
LB: loop body
LE: loop exit
PB: predicated region body
PF: predicated region fallthrough
CT: control target
= control target key end

     0   :  { %8 = vsyncpa [#allocation3], 0  ;;  %s1016_s0 = inlined_call_operand.hbm [shape: f32[12,768], index: 0, kind: input, shape index: {}]   ;;  %s1017_s1 = inlined_call_operand.hbm [shape: f32[768,128], index: 1, kind: input, shape index: {}]   ;;  %s1018_s2 = inlined_call_operand.vmem [shape: f32[1,2], index: 2, kind: input, shape index: {}]   ;;  %s1019_s3 = inlined_call_operand.vmem [shape: f32[12,2], index: 3, kind: output, shape index: {}]  }
   0x1   :  { %10 = vsyncpa [#allocation3 + $0x1], 0 }
   0x2   :  { %11 = vsyncpa [#allocation5], 0  ;;  %s888_s12 = smov 0   ;;  %s890_s13 = smov 0  }
   0x3   :  { %s892_s14 = smov 0   ;;  %s894_s15 = smov 0  }
   0x4 LB: > { %s907_s16 = sadd.s32 4294967295, %s862_s15   ;;  %p37_p0 = scmp.ne.s32.totalorder %s854_s13, %s850_s12  ;;  %s862_s15 = sphi %s894_s15, %s1034_s15   ;;  %s858_s14 = sphi %s892_s14, %s1033_s14   ;;  %s854_s13 = sphi %s890_s13, %s1032_s13   ;;  %s850_s12 = sphi %s888_s12, %s1031_s12  }
   0x5   : > { %p1020_p1 = scmp.eq.s32.totalorder %s907_s16, 0  ;;  %p600_p2 = scmp.ge.s32.totalorder %s862_s15, 1 }
   0x6   : > { %p116_p3 = scmp.lt.s32.totalorder %s862_s15, 3  ;;  %s864_s19 = smov [#allocation4]  }
   0x7   : > { %p915_p4 = por %p1020_p1, %p37_p0  ;;  %s128_s20 = sshll.u32 %s864_s19, 4  ;;  %s129_s20 = int_to_ptr.vmem [resolvable:$true] %s128_s20 }
   0x8   : > { %p919_p5 = pnand %p600_p2, %p116_p3  ;;  %s932_s22 = sadd.s32 1, %s862_s15  }
   0x9   : > { %s1023_s17 = scalar_select %p915_p4, 1, 0 }
   0xa   : > { %s1024_s18 = scalar_select %p919_p5, 1, 0 }
   0xb   : > { %p724_p6 = pneg %p919_p5  ;;  %s24_s23 = sadd.s32 1, %s858_s14 }
   0xc   : > { %s21_s24 = ssub.s32 %s862_s15, %s932_s22  ;;  %s781_s25 = scalar_lea.vmem %s129_s20, 12288 }
   0xd   : > { %p927_p7 = pnand %p724_p6, %p1020_p1  ;;  %p782_p9 = scmp.ne.s32.totalorder %s129_s20, %s781_s25 }
   0xe   : > { %p789_p12 = scmp.lt.s32.totalorder %s129_s20, %s129_s20  ;;  %p790_p13 = scmp.lt.s32.totalorder %s781_s25, %s781_s25 }
   0xf   : > { %p772_p8 = pneg %p927_p7 }
  0x10   : > { %p791_p0 = por %p790_p13, %p789_p12 }
  0x11   : > { %p784_p10 = pnand %p782_p9, %p772_p8 }
  0x13   : > { %p785_p11 = pneg %p784_p10 }
  0x15   : > { %p792_p2 = pnand %p791_p0, %p785_p11 }
  0x17   : > { %795 = shalt.err (!%p792_p2)
}
  0x18   : > { %s865_s26 = smov 128   ;;  %s866_s27 = smov 8  }
  0x19   : > { %727 = dma.hbm_to_vmem [thread:$0]  (!%p927_p7), %s1017_s1, 12288, %s129_s20, [#allocation5], %s865_s26, %s865_s26, %s866_s27  }
  0x1a   : > { %p22_p3 = scmp.eq.s32.totalorder %s21_s24, 0  ;;  %p31_p6 = scmp.ne.s32.totalorder %s858_s14, %s854_s13 }
  0x1b   : > { %p32_p8 = scmp.eq.s32.totalorder %s862_s15, 0  ;;  %p733_p9 = scmp.lt.s32.totalorder %s862_s15, 2 }
  0x1c   : > { %s949_s30 = scalar_select %p22_p3, %s858_s14, %s24_s23  }
  0x1d   : > { %p33_p10 = por %p32_p8, %p31_p6  ;;  %s145_s4 = sand.u32 1, %s858_s14  }
  0x1e   : > { %s715_s5 = smul.u32 48, %s145_s4  ;;  %s146_s19 = scalar_lea.sflag [#allocation3], %s145_s4 }
  0x1f   : > { %s716_s6 = smul.u32 768, %s862_s15  ;;  %p953_p11 = pnand %p733_p9, %p33_p10 }
  0x20   : > { %s149_s11 = scalar_lea.vmem [#allocation2], %s715_s5  ;;  %s801_s23 = scalar_lea.hbm %s1016_s0, 1536 }
  0x21   : > { %s960_s10 = scalar_lea.hbm %s1016_s0, %s716_s6  ;;  %s157_s12 = sshll.u32 %s149_s11, 4  ;;  %s158_s12 = int_to_ptr.vmem [resolvable:$true] %s157_s12 }
  0x22   : > { %s796_s20 = scalar_lea.hbm %s960_s10, 768  ;;  %p798_p12 = pneg %p953_p11 }
  0x23   : > { %p797_p7 = scmp.ne.s32.totalorder %s960_s10, %s796_s20  ;;  %p802_p2 = scmp.lt.s32.totalorder %s960_s10, %s1016_s0 }
  0x24   : > { %p803_p3 = scmp.lt.s32.totalorder %s801_s23, %s796_s20 }
  0x25   : > { %p799_p13 = pnand %p798_p12, %p797_p7 }
  0x26   : > { %p804_p6 = por %p803_p3, %p802_p2 }
  0x27   : > { %p800_p0 = pneg %p799_p13 }
  0x29   : > { %p805_p8 = pnand %p804_p6, %p800_p0 }
  0x2b   : > { %808 = shalt.err (!%p805_p8)
}
  0x2c   : > { %s809_s26 = scalar_lea.vmem %s158_s12, 768  ;;  %s867_s27 = smov [#allocation2]  }
  0x2d   : > { %p810_p9 = scmp.ne.s32.totalorder %s158_s12, %s809_s26  ;;  %s814_s28 = sshll.u32 %s867_s27, 4  ;;  %s815_s28 = int_to_ptr.vmem [resolvable:$false] %s814_s28 }
  0x2e   : > { %s816_s29 = scalar_lea.vmem %s815_s28, 1536  ;;  %p817_p7 = scmp.lt.s32.totalorder %s158_s12, %s815_s28 }
  0x2f   : > { %p812_p10 = pnand %p810_p9, %p798_p12  ;;  %p818_p13 = scmp.lt.s32.totalorder %s816_s29, %s809_s26 }
  0x31   : > { %p813_p1 = pneg %p812_p10  ;;  %p819_p4 = por %p818_p13, %p817_p7 }
  0x33   : > { %p820_p5 = pnand %p819_p4, %p813_p1 }
  0x35   : > { %823 = shalt.err (!%p820_p5)
}
  0x36   : > { %731 = dma.hbm_to_vmem [thread:$0]  (!%p953_p11), %s960_s10, 768, %s158_s12, %s146_s19  }
  0x37   : > { %p1027_p0 = scmp.ne.s32.totalorder %s1024_s18, 0 }
  0x38   : > { %s168_s4 = sand.u32 (!%p1027_p0), 1, %s854_s13   ;;  %p1028_p12 = scmp.ne.s32.totalorder (!%p1027_p0), %s1023_s17, 0 }
  0x39   : > { %166 = sbr.rel (%p1027_p0) target bundleno = 336 (0x150), region = 32  ;;  %s169_s6 = scalar_lea.sflag (!%p1027_p0), [#allocation3], %s168_s4 }
  0x3a   : > { %s717_s5 = smul.u32 (!%p1027_p0), 48, %s168_s4 }
  0x3c   : > { %s979_s8 = scalar_lea.vmem (!%p1027_p0), [#allocation2], %s717_s5 }
  0x3e   : > { %841 = dma.done.wait (%p1028_p12), %s169_s6, 768  }
  0x3f   : > { %843 = vsyncadd (%p1028_p12), %s169_s6, 4294966528  ;;  %p1029_p1 = scmp.eq.s32.totalorder %s907_s16, 0 }
  0x41   : > { %845 = dma.done.wait (%p1029_p1), [#allocation5], 12288   ;;  %p1030_p4 = pmov %p1029_p1 }
  0x42   : > { %v239_v0 = vld [vmem:[#allocation4 + $0xf8] sm:$0xff]  ;;  %v238_v4 = vld [vmem:[#allocation4 + $0xf0] sm:$0xff]  ;;  %v237_v8 = vld [vmem:[#allocation4 + $0xe8] sm:$0xff]  ;;  %p198_p5 = scmp.lt.s32.totalorder %s907_s16, 1  ;;  %vm522_vm0 = vcmask 15360  }
  0x43   : > { %847 = vsyncadd (%p1030_p4), [#allocation5], 4294955008  ;;  %v271_v1 = vld [vmem:[#allocation4 + $0x1f8] sm:$0xff]  ;;  %610 = vmatprep.subr.mxu0 %v239_v0  ;;  %v270_v5 = vld [vmem:[#allocation4 + $0x1f0] sm:$0xff] }
  0x44   : > { %v223_v2 = vld [vmem:[#allocation4 + $0x78] sm:$0xff]  ;;  %645 = vmatprep.subr.mxu1 %v271_v1  ;;  %v222_v6 = vld [vmem:[#allocation4 + $0x70] sm:$0xff]  ;;  %v269_v9 = vld [vmem:[#allocation4 + $0x1e8] sm:$0xff]  ;;  %s1036_s16 = smov (!%p198_p5, %s907_s16), 1 }
  0x45   : > { %v255_v3 = vld [vmem:[#allocation4 + $0x178] sm:$0xff]  ;;  %611 = vmatpush3.msra.mxu0 %v223_v2  ;;  %v254_v7 = vld [vmem:[#allocation4 + $0x170] sm:$0xff]  ;;  %v221_v10 = vld [vmem:[#allocation4 + $0x68] sm:$0xff]  ;;  %s606_s17 = sshll.u32 %s1036_s16, 3 }
  0x46   : > { %646 = vmatpush3.msra.mxu1 %v255_v3  ;;  %612 = vmatprep.subr.mxu0 %v238_v4  ;;  %v253_v11 = vld [vmem:[#allocation4 + $0x168] sm:$0xff]  ;;  %v236_v12 = vld [vmem:[#allocation4 + $0xe0] sm:$0xff]  ;;  %v235_v16 = vld [vmem:[#allocation4 + $0xd8] sm:$0xff]  ;;  %s201_s11 = scalar_lea.vmem %s1019_s3, %s606_s17 }
  0x47   : > { %647 = vmatprep.subr.mxu1 %v270_v5  ;;  %613 = vmatpush3.msra.mxu0 %v222_v6  ;;  %v268_v13 = vld [vmem:[#allocation4 + $0x1e0] sm:$0xff]  ;;  %v267_v17 = vld [vmem:[#allocation4 + $0x1d8] sm:$0xff]  ;;  %v234_v20 = vld [vmem:[#allocation4 + $0xd0] sm:$0xff] }
  0x48   : > { %648 = vmatpush3.msra.mxu1 %v254_v7  ;;  %614 = vmatprep.subr.mxu0 %v237_v8  ;;  %v220_v14 = vld [vmem:[#allocation4 + $0x60] sm:$0xff]  ;;  %v219_v18 = vld [vmem:[#allocation4 + $0x58] sm:$0xff]  ;;  %v266_v21 = vld [vmem:[#allocation4 + $0x1d0] sm:$0xff] }
  0x49   : > { %649 = vmatprep.subr.mxu1 %v269_v9  ;;  %v252_v15 = vld [vmem:[#allocation4 + $0x160] sm:$0xff]  ;;  %615 = vmatpush3.msra.mxu0 %v221_v10  ;;  %v251_v19 = vld [vmem:[#allocation4 + $0x158] sm:$0xff]  ;;  %v218_v22 = vld [vmem:[#allocation4 + $0x50] sm:$0xff] }
  0x4a   : > { %650 = vmatpush3.msra.mxu1 %v253_v11  ;;  %616 = vmatprep.subr.mxu0 %v236_v12  ;;  %v250_v23 = vld [vmem:[#allocation4 + $0x150] sm:$0xff]  ;;  %v233_v24 = vld [vmem:[#allocation4 + $0xc8] sm:$0xff]  ;;  %v232_v28 = vld [vmem:[#allocation4 + $0xc0] sm:$0xff] }
  0x4b   : > { %651 = vmatprep.subr.mxu1 %v268_v13  ;;  %617 = vmatpush3.msra.mxu0 %v220_v14  ;;  %v265_v25 = vld [vmem:[#allocation4 + $0x1c8] sm:$0xff]  ;;  %v264_v29 = vld [vmem:[#allocation4 + $0x1c0] sm:$0xff]  ;;  %v231_v32 = vld [vmem:[#allocation4 + $0xb8] sm:$0xff] }
  0x4c   : > { %652 = vmatpush3.msra.mxu1 %v252_v15  ;;  %618 = vmatprep.subr.mxu0 %v235_v16  ;;  %v217_v26 = vld [vmem:[#allocation4 + $0x48] sm:$0xff]  ;;  %v216_v30 = vld [vmem:[#allocation4 + $0x40] sm:$0xff]  ;;  %v263_v33 = vld [vmem:[#allocation4 + $0x1b8] sm:$0xff] }
  0x4d   : > { %653 = vmatprep.subr.mxu1 %v267_v17  ;;  %619 = vmatpush3.msra.mxu0 %v219_v18  ;;  %v249_v27 = vld [vmem:[#allocation4 + $0x148] sm:$0xff]  ;;  %v248_v31 = vld [vmem:[#allocation4 + $0x140] sm:$0xff]  ;;  %v215_v34 = vld [vmem:[#allocation4 + $0x38] sm:$0xff] }
  0x4e   : > { %654 = vmatpush3.msra.mxu1 %v251_v19  ;;  %620 = vmatprep.subr.mxu0 %v234_v20  ;;  %v247_v35 = vld [vmem:[#allocation4 + $0x138] sm:$0xff]  ;;  %v230_v36 = vld [vmem:[#allocation4 + $0xb0] sm:$0xff]  ;;  %v229_v40 = vld [vmem:[#allocation4 + $0xa8] sm:$0xff] }
  0x4f   : > { %655 = vmatprep.subr.mxu1 %v266_v21  ;;  %621 = vmatpush3.msra.mxu0 %v218_v22  ;;  %v262_v37 = vld [vmem:[#allocation4 + $0x1b0] sm:$0xff]  ;;  %v261_v41 = vld [vmem:[#allocation4 + $0x1a8] sm:$0xff]  ;;  %v228_v44 = vld [vmem:[#allocation4 + $0xa0] sm:$0xff] }
  0x50   : > { %656 = vmatpush3.msra.mxu1 %v250_v23  ;;  %622 = vmatprep.subr.mxu0 %v233_v24  ;;  %v214_v38 = vld [vmem:[#allocation4 + $0x30] sm:$0xff]  ;;  %v213_v42 = vld [vmem:[#allocation4 + $0x28] sm:$0xff]  ;;  %v260_v45 = vld [vmem:[#allocation4 + $0x1a0] sm:$0xff] }
  0x51   : > { %657 = vmatprep.subr.mxu1 %v265_v25  ;;  %623 = vmatpush3.msra.mxu0 %v217_v26  ;;  %v246_v39 = vld [vmem:[#allocation4 + $0x130] sm:$0xff]  ;;  %v245_v43 = vld [vmem:[#allocation4 + $0x128] sm:$0xff]  ;;  %v212_v46 = vld [vmem:[#allocation4 + $0x20] sm:$0xff] }
  0x52   : > { %658 = vmatpush3.msra.mxu1 %v249_v27  ;;  %624 = vmatprep.subr.mxu0 %v232_v28  ;;  %v244_v47 = vld [vmem:[#allocation4 + $0x120] sm:$0xff]  ;;  %v227_v48 = vld [vmem:[#allocation4 + $0x98] sm:$0xff]  ;;  %v226_v52 = vld [vmem:[#allocation4 + $0x90] sm:$0xff] }
  0x53   : > { %659 = vmatprep.subr.mxu1 %v264_v29  ;;  %625 = vmatpush3.msra.mxu0 %v216_v30  ;;  %v259_v49 = vld [vmem:[#allocation4 + $0x198] sm:$0xff]  ;;  %v258_v53 = vld [vmem:[#allocation4 + $0x190] sm:$0xff]  ;;  %v225_v56 = vld [vmem:[#allocation4 + $0x88] sm:$0xff] }
  0x54   : > { %660 = vmatpush3.msra.mxu1 %v248_v31  ;;  %626 = vmatprep.subr.mxu0 %v231_v32  ;;  %v211_v50 = vld [vmem:[#allocation4 + $0x18] sm:$0xff]  ;;  %v210_v54 = vld [vmem:[#allocation4 + $0x10] sm:$0xff]  ;;  %v257_v57 = vld [vmem:[#allocation4 + $0x188] sm:$0xff] }
  0x55   : > { %661 = vmatprep.subr.mxu1 %v263_v33  ;;  %627 = vmatpush3.msra.mxu0 %v215_v34  ;;  %v243_v51 = vld [vmem:[#allocation4 + $0x118] sm:$0xff]  ;;  %v242_v55 = vld [vmem:[#allocation4 + $0x110] sm:$0xff]  ;;  %v209_v58 = vld [vmem:[#allocation4 + $0x8] sm:$0xff] }
  0x56   : > { %662 = vmatpush3.msra.mxu1 %v247_v35  ;;  %628 = vmatprep.subr.mxu0 %v230_v36  ;;  %v241_v59 = vld [vmem:[#allocation4 + $0x108] sm:$0xff]  ;;  %v224_v60 = vld [vmem:[#allocation4 + $0x80] sm:$0xff]  ;;  %v303_v4 = vld [vmem:[#allocation4 + $0x2f8] sm:$0xff] }
  0x57   : > { %663 = vmatprep.subr.mxu1 %v262_v37  ;;  %629 = vmatpush3.msra.mxu0 %v214_v38  ;;  %v256_v61 = vld [vmem:[#allocation4 + $0x180] sm:$0xff]  ;;  %v203_v63 = vld [vmem:[%s979_s8 + $0x8] sm:$0xff]  ;;  %v205_v1 = vld [vmem:[%s979_s8 + $0x18] sm:$0xff] }
  0x58   : > { %664 = vmatpush3.msra.mxu1 %v246_v39  ;;  %630 = vmatprep.subr.mxu0 %v229_v40  ;;  %v208_v62 = vld [vmem:[#allocation4] sm:$0xff]  ;;  %v287_v5 = vld [vmem:[#allocation4 + $0x278] sm:$0xff]  ;;  %v302_v7 = vld [vmem:[#allocation4 + $0x2f0] sm:$0xff] }
  0x59   : > { %665 = vmatprep.subr.mxu1 %v261_v41  ;;  %631 = vmatpush3.msra.mxu0 %v213_v42  ;;  %v240_v0 = vld [vmem:[#allocation4 + $0x100] sm:$0xff]  ;;  %v207_v6 = vld [vmem:[%s979_s8 + $0x28] sm:$0xff]  ;;  %v286_v8 = vld [vmem:[#allocation4 + $0x270] sm:$0xff] }
  0x5a   : > { %666 = vmatpush3.msra.mxu1 %v245_v43  ;;  %632 = vmatprep.subr.mxu0 %v228_v44  ;;  %v202_v2 = vld [vmem:[%s979_s8] sm:$0xff]  ;;  %v204_v3 = vld [vmem:[%s979_s8 + $0x10] sm:$0xff]  ;;  %v301_v9 = vld [vmem:[#allocation4 + $0x2e8] sm:$0xff] }
  0x5b   : > { %667 = vmatprep.subr.mxu1 %v260_v45  ;;  %633 = vmatpush3.msra.mxu0 %v212_v46  ;;  %v285_v10 = vld [vmem:[#allocation4 + $0x268] sm:$0xff]  ;;  %v300_v11 = vld [vmem:[#allocation4 + $0x2e0] sm:$0xff]  ;;  %v299_v13 = vld [vmem:[#allocation4 + $0x2d8] sm:$0xff] }
  0x5c   : > { %668 = vmatpush3.msra.mxu1 %v244_v47  ;;  %634 = vmatprep.subr.mxu0 %v227_v48  ;;  %v284_v12 = vld [vmem:[#allocation4 + $0x260] sm:$0xff]  ;;  %v283_v14 = vld [vmem:[#allocation4 + $0x258] sm:$0xff]  ;;  %v298_v15 = vld [vmem:[#allocation4 + $0x2d0] sm:$0xff] }
  0x5d   : > { %669 = vmatprep.subr.mxu1 %v259_v49  ;;  %635 = vmatpush3.msra.mxu0 %v211_v50  ;;  %v282_v16 = vld [vmem:[#allocation4 + $0x250] sm:$0xff]  ;;  %v297_v17 = vld [vmem:[#allocation4 + $0x2c8] sm:$0xff]  ;;  %v296_v19 = vld [vmem:[#allocation4 + $0x2c0] sm:$0xff] }
  0x5e   : > { %670 = vmatpush3.msra.mxu1 %v243_v51  ;;  %636 = vmatprep.subr.mxu0 %v226_v52  ;;  %v281_v18 = vld [vmem:[#allocation4 + $0x248] sm:$0xff]  ;;  %v280_v20 = vld [vmem:[#allocation4 + $0x240] sm:$0xff]  ;;  %v295_v21 = vld [vmem:[#allocation4 + $0x2b8] sm:$0xff] }
  0x5f   : > { %671 = vmatprep.subr.mxu1 %v258_v53  ;;  %637 = vmatpush3.msra.mxu0 %v210_v54  ;;  %v279_v22 = vld [vmem:[#allocation4 + $0x238] sm:$0xff]  ;;  %v294_v23 = vld [vmem:[#allocation4 + $0x2b0] sm:$0xff]  ;;  %v293_v25 = vld [vmem:[#allocation4 + $0x2a8] sm:$0xff] }
  0x60   : > { %672 = vmatpush3.msra.mxu1 %v242_v55  ;;  %638 = vmatprep.subr.mxu0 %v225_v56  ;;  %v278_v24 = vld [vmem:[#allocation4 + $0x230] sm:$0xff]  ;;  %v277_v26 = vld [vmem:[#allocation4 + $0x228] sm:$0xff]  ;;  %v292_v27 = vld [vmem:[#allocation4 + $0x2a0] sm:$0xff] }
  0x61   : > { %673 = vmatprep.subr.mxu1 %v257_v57  ;;  %639 = vmatpush3.msra.mxu0 %v209_v58  ;;  %v276_v28 = vld [vmem:[#allocation4 + $0x220] sm:$0xff]  ;;  %v291_v29 = vld [vmem:[#allocation4 + $0x298] sm:$0xff]  ;;  %v290_v31 = vld [vmem:[#allocation4 + $0x290] sm:$0xff] }
  0x62   : > { %674 = vmatpush3.msra.mxu1 %v241_v59  ;;  %640 = vmatprep.subr.mxu0 %v224_v60  ;;  %v275_v30 = vld [vmem:[#allocation4 + $0x218] sm:$0xff]  ;;  %v274_v32 = vld [vmem:[#allocation4 + $0x210] sm:$0xff]  ;;  %v289_v33 = vld [vmem:[#allocation4 + $0x288] sm:$0xff] }
  0x63   : > { %675 = vmatprep.subr.mxu1 %v256_v61  ;;  %641 = vmatpush3.msra.mxu0 %v208_v62  ;;  %v273_v34 = vld [vmem:[#allocation4 + $0x208] sm:$0xff]  ;;  %v288_v35 = vld [vmem:[#allocation4 + $0x280] sm:$0xff] }
  0x64   : > { %368 = vmatprep.mubr.f32.mxu0 %v203_v63  ;;  %676 = vmatpush3.msra.mxu1 %v240_v0  ;;  %v272_v36 = vld [vmem:[#allocation4 + $0x200] sm:$0xff] }
  0x65   : > { %438 = vmatprep.mubr.f32.mxu1 %v205_v1  ;;  %369 = vmatmul.mubr.f32.vlgmr.msra.gmra.mxu0 %v202_v2  ;;  %v206_v37 = vld [vmem:[%s979_s8 + $0x20] sm:$0xff] }
  0x66   : > { %439 = vmatmul.mubr.f32.vlgmr.msra.gmra.mxu1 %v204_v3  ;;  %680 = vmatprep.subr.mxu0 %v303_v4  ;;  %v607_v48 = vld [vmem:[%s1018_s2] ss:$0 sm:$0xff] }
  0x67   : > { %508 = vmatprep.mubr.f32.mxu0 %v207_v6  ;;  %681 = vmatpush3.msra.mxu0 %v287_v5 }
  0x68   : > { %682 = vmatprep.subr.mxu0 %v302_v7 }
  0x69   : > { %683 = vmatpush3.msra.mxu0 %v286_v8 }
  0x6a   : > { %684 = vmatprep.subr.mxu0 %v301_v9 }
  0x6b   : > { %685 = vmatpush3.msra.mxu0 %v285_v10 }
  0x6c   : > { %686 = vmatprep.subr.mxu0 %v300_v11 }
  0x6d   : > { %687 = vmatpush3.msra.mxu0 %v284_v12 }
  0x6e   : > { %688 = vmatprep.subr.mxu0 %v299_v13 }
  0x6f   : > { %689 = vmatpush3.msra.mxu0 %v283_v14 }
  0x70   : > { %690 = vmatprep.subr.mxu0 %v298_v15 }
  0x71   : > { %691 = vmatpush3.msra.mxu0 %v282_v16 }
  0x72   : > { %692 = vmatprep.subr.mxu0 %v297_v17 }
  0x73   : > { %693 = vmatpush3.msra.mxu0 %v281_v18 }
  0x74   : > { %694 = vmatprep.subr.mxu0 %v296_v19 }
  0x75   : > { %695 = vmatpush3.msra.mxu0 %v280_v20 }
  0x76   : > { %696 = vmatprep.subr.mxu0 %v295_v21 }
  0x77   : > { %697 = vmatpush3.msra.mxu0 %v279_v22 }
  0x78   : > { %698 = vmatprep.subr.mxu0 %v294_v23 }
  0x79   : > { %699 = vmatpush3.msra.mxu0 %v278_v24 }
  0x7a   : > { %700 = vmatprep.subr.mxu0 %v293_v25 }
  0x7b   : > { %701 = vmatpush3.msra.mxu0 %v277_v26 }
  0x7c   : > { %702 = vmatprep.subr.mxu0 %v292_v27 }
  0x7d   : > { %703 = vmatpush3.msra.mxu0 %v276_v28 }
  0x7e   : > { %704 = vmatprep.subr.mxu0 %v291_v29 }
  0x7f   : > { %705 = vmatpush3.msra.mxu0 %v275_v30 }
  0x80   : > { %706 = vmatprep.subr.mxu0 %v290_v31 }
  0x81   : > { %707 = vmatpush3.msra.mxu0 %v274_v32 }
  0x82   : > { %708 = vmatprep.subr.mxu0 %v289_v33 }
  0x83   : > { %709 = vmatpush3.msra.mxu0 %v273_v34 }
  0x84   : > { %710 = vmatprep.subr.mxu0 %v288_v35 }
  0x85   : > { %711 = vmatpush3.msra.mxu0 %v272_v36 }
  0x86   : > { %509 = vmatmul.mubr.f32.vlgmr.msra.gmra.mxu0 %v206_v37 }
 0x125   : > { %v642_v38 = vpop.f32.mrf.mxu0 }
 0x126   : > { %v677_v39 = vpop.f32.mrf.mxu1 }
 0x127   : > { %v643_v40 = vpop.f32.mrf.mxu0 }
 0x128   : > { %v678_v41 = vpop.f32.mrf.mxu1  ;;  %v644_v42 = vadd.f32 %v643_v40, %v642_v38 }
 0x129   : > { %v679_v43 = vadd.f32 %v678_v41, %v677_v39 }
 0x12b   : > { %v441_v46 = vadd.f32 %v679_v43, %v644_v42 }
 0x146   : > { %v712_v44 = vpop.f32.mrf.mxu0 }
 0x148   : > { %v713_v45 = vpop.f32.mrf.mxu0 }
 0x149   : > { %v714_v47 = vadd.f32 %v713_v45, %v712_v44 }
 0x14b   : > { %v511_v49 = vadd.f32 %v714_v47, %v441_v46 }
 0x14d   : > { %v521_v50 = vadd.f32 %v607_v48, %v511_v49 }
 0x14f   : > { %523 = vst.msk [vmem:[%s201_s11] sm:$0xff] %vm522_vm0, %v521_v50 }
 0x150 PF: > { %p14_p11 = scmp.ge.s32.totalorder %s932_s22, 4   ;;  %s1031_s12 = smov %s854_s13 }
 0x151   : > { %s1032_s13 = smov %s858_s14  ;;  %s1033_s14 = smov %s949_s30 }
 0x152   : > { %s1034_s15 = smov %s932_s22  ;;  %16 = sbr.rel (!%p14_p11) target bundleno = 4 (0x4), region = 76 }
 0x157   :  { %543 = vsyncpa [#allocation3], 1 }
 0x158   :  { %545 = vsyncpa [#allocation3 + $0x1], 1 }
 0x159   :  { %546 = vsyncpa [#allocation5], 1 }

</bundles_post_ra>
